<compile_context>
chip_gen: v6e
topology: v6e:2x2x1
jax: 0.10.0
libtpu: 0.0.40
codegen_flags: <defaults>
</compile_context>

<pallas_src>
import jax
import jax.numpy as jnp
from jax.experimental import pallas as pl
from jax.experimental.pallas import tpu as pltpu


def _norm_kernel(scale_ref, bias_ref, img_ref, out_ref):
    # scale_ref / bias_ref: VMEM (TM, 1);  img_ref / out_ref: VMEM (TM, TL).
    # Single fused multiply-add per element, broadcast across the lane dim.
    out_ref[...] = img_ref[...] * scale_ref[...] + bias_ref[...]


def _pick_tile(dim, base, max_tile):
    """Largest divisor of `dim` that is a multiple of `base` and <= max_tile.

    Falls back to the full extent (always a legal BlockSpec block size).
    """
    best = None
    t = base
    limit = min(dim, max_tile)
    while t <= limit:
        if dim % t == 0:
            best = t
        t += base
    return best if best is not None else dim


def normalization_forward(img, mean, std):
    """img: (N, C, H, W); mean, std: (C,).  Per-channel normalization."""
    N, C, H, W = img.shape
    R, L = N * C, H * W

    # Fold the divide into precomputed scale/bias (tiny (C,) vectors -> the
    # wrapper-side work is negligible; the kernel does one FMA per element).
    scale = (1.0 / std).astype(img.dtype)
    bias = (-mean / std).astype(img.dtype)
    # Per-row (= per (n, c)) scale/bias as lane-broadcastable column vectors.
    scale_rows = jnp.tile(scale, N).reshape(R, 1)
    bias_rows = jnp.tile(bias, N).reshape(R, 1)

    # Collapse spatial dims -> lane-dense 2-D layout (free contiguous reshape).
    x2d = img.reshape(R, L)

    # Adaptive tiling: rows first (multiple of 8, capped), then grow the lane
    # tile to fill a ~2 MiB byte budget (multiple of 128, or full extent).
    # Double-buffered input + output tiles then take ~8 MiB of VMEM, safely
    # under the 16 MiB scoped default on v5e and far under v6e / v7x limits.
    itemsize = jnp.dtype(img.dtype).itemsize
    tile_bytes = 2 * 1024 * 1024
    TM = _pick_tile(R, 8, 256)
    lane_budget = max(128, tile_bytes // (TM * itemsize))
    TL = _pick_tile(L, 128, lane_budget)

    grid = (R // TM, L // TL)

    out2d = pl.pallas_call(
        _norm_kernel,
        out_shape=jax.ShapeDtypeStruct((R, L), img.dtype),
        grid_spec=pltpu.PrefetchScalarGridSpec(
            num_scalar_prefetch=0,
            grid=grid,
            in_specs=[
                pl.BlockSpec((TM, 1), lambda i, j: (i, 0)),    # scale
                pl.BlockSpec((TM, 1), lambda i, j: (i, 0)),    # bias
                pl.BlockSpec((TM, TL), lambda i, j: (i, j)),   # img
            ],
            out_specs=pl.BlockSpec((TM, TL), lambda i, j: (i, j)),
        ),
        compiler_params=pltpu.CompilerParams(
            # Pure elementwise map: both axes independent -> megacore-shardable.
            dimension_semantics=("parallel", "parallel"),
        ),
    )(scale_rows, bias_rows, x2d)

    return out2d.reshape(N, C, H, W)


if __name__ == "__main__":
    # VGG ImageNet normalization constants (what this module is used with).
    mean = jnp.array([0.485, 0.456, 0.406], dtype=jnp.float32)
    std = jnp.array([0.229, 0.224, 0.225], dtype=jnp.float32)

    key = jax.random.PRNGKey(0)
    img = jax.random.uniform(key, (2, 3, 16, 16), dtype=jnp.float32)

    out = normalization_forward(img, mean, std)
    out = jax.block_until_ready(out)

    # Reference check (identical broadcast semantics to the PyTorch module).
    ref = (img - mean.reshape(-1, 1, 1)) / std.reshape(-1, 1, 1)
    assert jnp.allclose(out, ref, atol=1e-5, rtol=1e-5), "mismatch vs reference"

    print("KERNEL_OK")
</pallas_src>

<mosaic_0001>
module attributes {stable_mosaic.version = 11 : i64} {
  func.func @_norm_kernel(%arg0: i32, %arg1: i32, %arg2: memref<6x1xf32, #tpu.memory_space<vmem>>, %arg3: memref<6x1xf32, #tpu.memory_space<vmem>>, %arg4: memref<6x256xf32, #tpu.memory_space<vmem>>, %arg5: memref<6x256xf32, #tpu.memory_space<vmem>>) attributes {dimension_semantics = [#tpu.dimension_semantics<parallel>, #tpu.dimension_semantics<parallel>], iteration_bounds = array<i64: 1, 1>, scalar_prefetch = 0 : i64, scratch_operands = 0 : i64, tpu.core_type = #tpu.core_type<tc>, window_params = [{transform_indices = @transform_0, window_bounds = array<i64: 6, 1>}, {transform_indices = @transform_1, window_bounds = array<i64: 6, 1>}, {transform_indices = @transform_2, window_bounds = array<i64: 6, 256>}, {transform_indices = @transform_3, window_bounds = array<i64: 6, 256>}]} {
    %c0 = arith.constant 0 : index
    %c0_0 = arith.constant 0 : index
    %0 = vector.load %arg4[%c0, %c0_0] : memref<6x256xf32, #tpu.memory_space<vmem>>, vector<6x256xf32>
    %c0_1 = arith.constant 0 : index
    %c0_2 = arith.constant 0 : index
    %1 = vector.load %arg2[%c0_1, %c0_2] : memref<6x1xf32, #tpu.memory_space<vmem>>, vector<6x1xf32>
    %2 = vector.broadcast %1 : vector<6x1xf32> to vector<6x256xf32>
    %3 = arith.mulf %0, %2 : vector<6x256xf32>
    %c0_3 = arith.constant 0 : index
    %c0_4 = arith.constant 0 : index
    %4 = vector.load %arg3[%c0_3, %c0_4] : memref<6x1xf32, #tpu.memory_space<vmem>>, vector<6x1xf32>
    %5 = vector.broadcast %4 : vector<6x1xf32> to vector<6x256xf32>
    %6 = arith.addf %3, %5 : vector<6x256xf32>
    %c0_5 = arith.constant 0 : index
    %c0_6 = arith.constant 0 : index
    %7 = vector.load %arg5[%c0_5, %c0_6] : memref<6x256xf32, #tpu.memory_space<vmem>>, vector<6x256xf32>
    tpu.vector_store %arg5[%c0_5, %c0_6], %6 {strides = array<i32>} : memref<6x256xf32, #tpu.memory_space<vmem>>, vector<6x256xf32>,
    return
  }
  func.func @transform_0(%arg0: i32, %arg1: i32) -> (i32, i32) {
    %c0_i32 = arith.constant 0 : i32
    %c0_i32_0 = arith.constant 0 : i32
    return %arg0, %c0_i32 : i32, i32
  }
  func.func @transform_1(%arg0: i32, %arg1: i32) -> (i32, i32) {
    %c0_i32 = arith.constant 0 : i32
    %c0_i32_0 = arith.constant 0 : i32
    return %arg0, %c0_i32 : i32, i32
  }
  func.func @transform_2(%arg0: i32, %arg1: i32) -> (i32, i32) {
    %c0_i32 = arith.constant 0 : i32
    return %arg0, %arg1 : i32, i32
  }
  func.func @transform_3(%arg0: i32, %arg1: i32) -> (i32, i32) {
    %c0_i32 = arith.constant 0 : i32
    return %arg0, %arg1 : i32, i32
  }
}

</mosaic_0001>

<bundles_post_ra>
// kernel: tpu_custom_call.1
= control target key start
LH: loop header
LB: loop body
LE: loop exit
PB: predicated region body
PF: predicated region fallthrough
CT: control target
= control target key end

     0   :  { %v74_v1 = vmov 0   ;;  %s111_s0 = inlined_call_operand.vmem [shape: f32[6,1], index: 0, kind: input, shape index: {}]   ;;  %s112_s1 = inlined_call_operand.vmem [shape: f32[6,1], index: 1, kind: input, shape index: {}]   ;;  %s113_s2 = inlined_call_operand.vmem [shape: f32[6,256], index: 2, kind: input, shape index: {}]   ;;  %s114_s3 = inlined_call_operand.hbm [shape: f32[6,256], index: 3, kind: output, shape index: {}]  }
   0x1   :  { %v17_v0 = vld [vmem:[%s111_s0] sm:$0x3f]  ;;  %51 = vset.pattern.permute.xlu0 %v74_v1 }
   0x2   :  { %8 = vsyncpa [#allocation3], 0  ;;  %20 = vperm.xlu0 %51, %v17_v0   ;;  %v25_v2 = vld [vmem:[%s112_s1] sm:$0x3f]  ;;  %v16_v5 = vld [vmem:[%s113_s2 + $0x8] sm:$0x3f] }
   0x3   :  { %v15_v4 = vld [vmem:[%s113_s2] sm:$0x3f]  ;;  %s75_s20 = smov [#allocation2]  }
   0x4   :  { %s41_s0 = sshll.u32 %s75_s20, 4  ;;  %s42_s0 = int_to_ptr.vmem [resolvable:$true] %s41_s0 }
   0x5   :  { %s52_s1 = scalar_lea.vmem %s42_s0, 256  ;;  %p57_p1 = scmp.lt.s32.totalorder %s42_s0, %s42_s0 }
   0x6   :  { %28 = vperm.xlu0 %51, %v25_v2   ;;  %p53_p0 = scmp.ne.s32.totalorder %s42_s0, %s52_s1  ;;  %p58_p2 = scmp.lt.s32.totalorder %s52_s1, %s52_s1 }
   0x8   :  { %p59_p3 = por %p58_p2, %p57_p1 }
   0xa   :  { %p60_p4 = pnand %p59_p3, %p53_p0 }
  0x7d   :  { %v21_v3 = vpop.permute.xlu0 %20 }
  0x7e   :  { %v23_v6 = vmul.f32 %v21_v3, %v15_v4  ;;  %v24_v7 = vmul.f32 %v21_v3, %v16_v5 }
  0x81   :  { %v29_v8 = vpop.permute.xlu0 %28 }
  0x82   :  { %v31_v9 = vadd.f32 %v29_v8, %v23_v6  ;;  %v32_v10 = vadd.f32 %v29_v8, %v24_v7 }
  0x84   :  { %33 = vst [vmem:[#allocation2] sm:$0x3f] %v31_v9  ;;  %34 = vst [vmem:[#allocation2 + $0x8] sm:$0x3f] %v32_v10 }
  0x85   :  { %63 = shalt.err (!%p60_p4)
}
  0x86   :  { %44 = dma.vmem_to_hbm [thread:$0]  %s42_s0, 256, %s114_s3, [#allocation3]  }
  0x87   :  { %72 = dma.done.wait [#allocation3], 256  }
  0x88   :  { %73 = vsyncadd [#allocation3], 4294967040 }
  0x89   :  { %48 = vsyncpa [#allocation3], 1 }

</bundles_post_ra>
